<compile_context>
chip_gen: v7x
topology: tpu7x:2x2x1
jax: 0.10.0
libtpu: 0.0.40
codegen_flags: <defaults>
</compile_context>

<pallas_src>
import functools
import math

import jax
import jax.numpy as jnp
from jax import lax
from jax.experimental import pallas as pl
from jax.experimental.pallas import tpu as pltpu


EPS = 1e-6
_LANES = 128
# ~1 MiB of f32 per block: amortizes the ~0.35 us per-grid-step overhead while
# keeping (2x in + 2x out double-buffers + elementwise temporaries) well under
# the scoped-VMEM limit on v5e/v6e/v7x.
_TARGET_BLOCK_ELEMS = 256 * 1024
_MIN_GRID_STEPS = 8  # >=2 (ideally ~8) steps: v7x megacore + pipelining engage


def _packed_layernorm_kernel(x_ref, w_ref, b_ref, seg_ref, bmat_ref, o_ref):
    """LayerNorm(eps=1e-6) over each patch of length P, G patches packed per row.

    x_ref    : (row_block, W)  with W = G * P (lane-dense when W % 128 == 0)
    w_ref    : (1, W)          LayerNorm weight tiled G times
    b_ref    : (1, W)          LayerNorm bias tiled G times
    seg_ref  : (W, G)          one-hot patch membership (lane w -> patch w // P)
    bmat_ref : (4G, 2W)        single-pass broadcast-back matrix (see wrapper)
    o_ref    : (row_block, W)
    """
    x = x_ref[...].astype(jnp.float32)
    seg = seg_ref[...]
    W = x.shape[-1]
    G = seg.shape[-1]
    inv_p = 1.0 / float(W // G)

    # --- Per-patch sums: independent single-pass MXU reduces. -----------------
    # Manual bf16 hi/lo split keeps the segmented sums exact at DEFAULT
    # precision (hi parts are bf16-exact, seg is 0/1, accumulation is f32),
    # avoiding the multi-pass Precision.HIGHEST path.
    x_hi = x.astype(jnp.bfloat16).astype(jnp.float32)
    x_lo = x - x_hi
    x2 = x * x
    x2_hi = x2.astype(jnp.bfloat16).astype(jnp.float32)
    x2_lo = x2 - x2_hi
    sum_x = (jnp.dot(x_hi, seg, preferred_element_type=jnp.float32) +
             jnp.dot(x_lo, seg, preferred_element_type=jnp.float32))
    sum_x2 = (jnp.dot(x2_hi, seg, preferred_element_type=jnp.float32) +
              jnp.dot(x2_lo, seg, preferred_element_type=jnp.float32))

    # var = E[x^2] - mean^2 removes the MXU->VPU->MXU round trip of the
    # two-pass form; the clamp guards the (rare) |mean| >> std cancellation.
    mean = sum_x * inv_p
    var = jnp.maximum(sum_x2 * inv_p - mean * mean, 0.0)
    inv = lax.rsqrt(var + EPS)  # EUP slot, only (row_block, G) elements

    # --- Broadcast per-patch (mean, inv) back to all W lanes. -----------------
    # ONE single-pass matmul against a constant 0/1 matrix (bf16 hi/lo split
    # again makes the truncation inside the MXU lossless) replaces the two
    # Precision.HIGHEST broadcast-back matmuls of the previous version.
    mean_hi = mean.astype(jnp.bfloat16).astype(jnp.float32)
    inv_hi = inv.astype(jnp.bfloat16).astype(jnp.float32)
    stats = jnp.concatenate(
        [mean_hi, mean - mean_hi, inv_hi, inv - inv_hi], axis=-1)  # (R, 4G)
    bc = jnp.dot(stats, bmat_ref[...],
                 preferred_element_type=jnp.float32)               # (R, 2W)
    mean_b = bc[:, :W]
    inv_b = bc[:, W:]

    y = (x - mean_b) * inv_b * w_ref[...].astype(jnp.float32) \
        + b_ref[...].astype(jnp.float32)
    o_ref[...] = y.astype(o_ref.dtype)


def _choose_packing(total_patches: int, patch_length: int) -> int:
    """Patches packed per kernel row; always lane-dense unless P % 128 == 0."""
    if patch_length % _LANES == 0:
        return 1  # already lane-dense
    g_dense = math.lcm(patch_length, _LANES) // patch_length
    for mult in (4, 2, 1):  # prefer wider lane-dense rows
        g = g_dense * mult
        if total_patches % g == 0:
            return g
    # No lane-dense packing divides the patch count exactly: keep lane density
    # anyway; the caller pads with < g_dense dummy patches (tiny, sliced away).
    return g_dense


def _choose_row_block(n_rows: int, width: int) -> int:
    if n_rows <= 8:
        return n_rows  # single full-extent block (always legal)
    cap = max(8, (_TARGET_BLOCK_ELEMS // width) // 8 * 8)  # VMEM budget
    # Aim for >= _MIN_GRID_STEPS grid steps so the pipeline overlaps and the
    # v7x megacore can shard the (parallel) row axis across both TensorCores.
    want = -(-n_rows // _MIN_GRID_STEPS)
    want = -(-want // 8) * 8
    return max(8, min(cap, want))


def patch_embed(x, weight, bias, *, sig_length, patch_length):
    """x: (B, 1, sig_length) -> (B, num_patches, patch_length)."""
    B, C, L = x.shape
    assert L == sig_length, "signal length does not match."
    assert C == 1, "squeeze(-2) in the reference assumes a single channel."
    assert sig_length >= patch_length
    P = patch_length
    num_patches = (max(sig_length, P) - P) // P + 1
    total_patches = B * num_patches
    used = num_patches * P

    # Non-overlapping unfold (step == size) == contiguous reshape.
    flat = x.reshape(B, L)
    if used != L:
        # torch.unfold drops the tail; this (rare) shape class pays one extra
        # HBM pass for the slice.
        # TODO(synk): fold the per-batch tail skip into the BlockSpec instead.
        flat = flat[:, :used]

    G = _choose_packing(total_patches, P)
    W = G * P
    pad_patches = (-total_patches) % G
    if pad_patches:
        # Keep the kernel lane-dense by padding a handful (< G) of dummy
        # patches; they normalize to garbage and are sliced away below.
        flat = jnp.pad(flat.reshape(1, total_patches * P),
                       ((0, 0), (0, pad_patches * P)))
    n_rows = (total_patches + pad_patches) // G
    x2d = flat.reshape(n_rows, W)  # pure reshape on the common path

    row_block = _choose_row_block(n_rows, W)
    grid = (pl.cdiv(n_rows, row_block),)  # ragged last block masked by Pallas

    f32 = jnp.float32
    # LayerNorm affine params tiled across the G packed patches (tiny, resident).
    w2d = jnp.tile(weight.astype(f32).reshape(1, P), (1, G))
    b2d = jnp.tile(bias.astype(f32).reshape(1, P), (1, G))

    # One-hot patch membership (lane w -> patch w // P) for the segmented sums,
    # plus the combined broadcast-back matrix:
    #   [mean_hi|mean_lo|inv_hi|inv_lo] (R,4G) @ bmat (4G,2W) = [mean_b | inv_b]
    lane_patch = jnp.arange(W, dtype=jnp.int32) // P
    seg = (lane_patch[:, None] == jnp.arange(G, dtype=jnp.int32)[None, :]).astype(f32)
    segt = seg.T
    zeros = jnp.zeros_like(segt)
    bmat = jnp.concatenate([
        jnp.concatenate([segt, zeros], axis=1),   # mean_hi
        jnp.concatenate([segt, zeros], axis=1),   # mean_lo
        jnp.concatenate([zeros, segt], axis=1),   # inv_hi
        jnp.concatenate([zeros, segt], axis=1),   # inv_lo
    ], axis=0)                                    # (4G, 2W)

    out = pl.pallas_call(
        _packed_layernorm_kernel,
        out_shape=jax.ShapeDtypeStruct((n_rows, W), x.dtype),
        grid_spec=pltpu.PrefetchScalarGridSpec(
            num_scalar_prefetch=0,
            grid=grid,
            in_specs=[
                pl.BlockSpec((row_block, W), lambda i: (i, 0)),
                pl.BlockSpec((1, W), lambda i: (0, 0)),
                pl.BlockSpec((1, W), lambda i: (0, 0)),
                pl.BlockSpec((W, G), lambda i: (0, 0)),
                pl.BlockSpec((4 * G, 2 * W), lambda i: (0, 0)),
            ],
            out_specs=pl.BlockSpec((row_block, W), lambda i: (i, 0)),
        ),
        compiler_params=pltpu.CompilerParams(
            dimension_semantics=("parallel",),
            vmem_limit_bytes=32 * 1024 * 1024,
        ),
    )(x2d, w2d, b2d, seg, bmat)

    if pad_patches:
        out = out.reshape(n_rows * G, P)[:total_patches]
    # Unpacking is again a pure contiguous reshape.
    return out.reshape(B, num_patches, P)


def _reference(x, weight, bias, *, patch_length):
    B, C, L = x.shape
    P = patch_length
    num_patches = L // P
    xp = x[:, :, : num_patches * P].reshape(B, C, num_patches, P)
    xp = jnp.transpose(xp, (0, 2, 1, 3)).reshape(B, num_patches, P)  # squeeze(-2)
    xp = xp.astype(jnp.float32)
    mean = jnp.mean(xp, axis=-1, keepdims=True)
    var = jnp.mean((xp - mean) ** 2, axis=-1, keepdims=True)
    return (xp - mean) / jnp.sqrt(var + EPS) * weight + bias


if __name__ == "__main__":
    sig_length, patch_length = 2400, 48  # module defaults
    num_patches = sig_length // patch_length

    key = jax.random.PRNGKey(0)
    kx, kw, kb = jax.random.split(key, 3)

    # nn.LayerNorm default init is ones/zeros; perturb so the affine path is tested.
    weight = jnp.ones((patch_length,), jnp.float32) + 0.01 * jax.random.normal(
        kw, (patch_length,), jnp.float32
    )
    bias = 0.01 * jax.random.normal(kb, (patch_length,), jnp.float32)

    fn = jax.jit(
        functools.partial(
            patch_embed, sig_length=sig_length, patch_length=patch_length
        )
    )

    # Case 1: B=4 -> total patches divisible by the lane-dense packing (fast path).
    # Case 2: B=2 -> exercises the padded-tail fallback (still lane-dense).
    for B in (4, 2):
        x = jax.random.normal(kx, (B, 1, sig_length), dtype=jnp.float32)
        out = fn(x, weight, bias)
        jax.block_until_ready(out)
        ref = _reference(x, weight, bias, patch_length=patch_length)
        assert out.shape == (B, num_patches, patch_length)
        err = float(jnp.max(jnp.abs(out - ref)))
        assert jnp.allclose(out, ref, atol=1e-4, rtol=1e-4), err

    print("KERNEL_OK")
</pallas_src>

<mosaic_0001>
module attributes {stable_mosaic.version = 11 : i64} {
  func.func @_packed_layernorm_kernel(%arg0: i32, %arg1: memref<8x384xf32, #tpu.memory_space<vmem>>, %arg2: memref<1x384xf32, #tpu.memory_space<vmem>>, %arg3: memref<1x384xf32, #tpu.memory_space<vmem>>, %arg4: memref<384x8xf32, #tpu.memory_space<vmem>>, %arg5: memref<32x768xf32, #tpu.memory_space<vmem>>, %arg6: memref<8x384xf32, #tpu.memory_space<vmem>>) attributes {dimension_semantics = [#tpu.dimension_semantics<parallel>], iteration_bounds = array<i64: 4>, scalar_prefetch = 0 : i64, scratch_operands = 0 : i64, tpu.core_type = #tpu.core_type<tc>, window_params = [{transform_indices = @transform_0, window_bounds = array<i64: 8, 384>}, {pipeline_mode = #tpu.pipeline_mode<synchronous>, transform_indices = @transform_1, window_bounds = array<i64: 1, 384>}, {pipeline_mode = #tpu.pipeline_mode<synchronous>, transform_indices = @transform_2, window_bounds = array<i64: 1, 384>}, {pipeline_mode = #tpu.pipeline_mode<synchronous>, transform_indices = @transform_3, window_bounds = array<i64: 384, 8>}, {pipeline_mode = #tpu.pipeline_mode<synchronous>, transform_indices = @transform_4, window_bounds = array<i64: 32, 768>}, {transform_indices = @transform_5, window_bounds = array<i64: 8, 384>}]} {
    %c0 = arith.constant 0 : index
    %c0_0 = arith.constant 0 : index
    %0 = vector.load %arg1[%c0, %c0_0] : memref<8x384xf32, #tpu.memory_space<vmem>>, vector<8x384xf32>
    %c0_1 = arith.constant 0 : index
    %c0_2 = arith.constant 0 : index
    %1 = vector.load %arg4[%c0_1, %c0_2] : memref<384x8xf32, #tpu.memory_space<vmem>>, vector<384x8xf32>
    %2 = arith.truncf %0 : vector<8x384xf32> to vector<8x384xbf16>
    %3 = arith.extf %2 : vector<8x384xbf16> to vector<8x384xf32>
    %4 = arith.subf %0, %3 : vector<8x384xf32>
    %5 = arith.mulf %0, %0 : vector<8x384xf32>
    %6 = arith.truncf %5 : vector<8x384xf32> to vector<8x384xbf16>
    %7 = arith.extf %6 : vector<8x384xbf16> to vector<8x384xf32>
    %8 = arith.subf %5, %7 : vector<8x384xf32>
    %cst = arith.constant dense<0.000000e+00> : vector<8x8xf32>
    %9 = tpu.matmul %3, %1, %cst {dimension_numbers = #tpu.dot_dimension_numbers<[1], [0], [0], [1], [0, 0, 1, 1], [], []>} : vector<8x384xf32>, vector<384x8xf32>, vector<8x8xf32> -> vector<8x8xf32>
    %cst_3 = arith.constant dense<0.000000e+00> : vector<8x8xf32>
    %10 = tpu.matmul %4, %1, %cst_3 {dimension_numbers = #tpu.dot_dimension_numbers<[1], [0], [0], [1], [0, 0, 1, 1], [], []>} : vector<8x384xf32>, vector<384x8xf32>, vector<8x8xf32> -> vector<8x8xf32>
    %11 = arith.addf %9, %10 : vector<8x8xf32>
    %cst_4 = arith.constant dense<0.000000e+00> : vector<8x8xf32>
    %12 = tpu.matmul %7, %1, %cst_4 {dimension_numbers = #tpu.dot_dimension_numbers<[1], [0], [0], [1], [0, 0, 1, 1], [], []>} : vector<8x384xf32>, vector<384x8xf32>, vector<8x8xf32> -> vector<8x8xf32>
    %cst_5 = arith.constant dense<0.000000e+00> : vector<8x8xf32>
    %13 = tpu.matmul %8, %1, %cst_5 {dimension_numbers = #tpu.dot_dimension_numbers<[1], [0], [0], [1], [0, 0, 1, 1], [], []>} : vector<8x384xf32>, vector<384x8xf32>, vector<8x8xf32> -> vector<8x8xf32>
    %14 = arith.addf %12, %13 : vector<8x8xf32>
    %cst_6 = arith.constant 0.020833334 : f32
    %15 = vector.broadcast %cst_6 : f32 to vector<8x8xf32>
    %16 = arith.mulf %11, %15 : vector<8x8xf32>
    %cst_7 = arith.constant 0.020833334 : f32
    %17 = vector.broadcast %cst_7 : f32 to vector<8x8xf32>
    %18 = arith.mulf %14, %17 : vector<8x8xf32>
    %19 = arith.mulf %16, %16 : vector<8x8xf32>
    %20 = arith.subf %18, %19 : vector<8x8xf32>
    %cst_8 = arith.constant 0.000000e+00 : f32
    %21 = vector.broadcast %cst_8 : f32 to vector<8x8xf32>
    %22 = arith.maximumf %20, %21 : vector<8x8xf32>
    %cst_9 = arith.constant 9.99999997E-7 : f32
    %23 = vector.broadcast %cst_9 : f32 to vector<8x8xf32>
    %24 = arith.addf %22, %23 : vector<8x8xf32>
    %25 = math.rsqrt %24 : vector<8x8xf32>
    %26 = arith.truncf %16 : vector<8x8xf32> to vector<8x8xbf16>
    %27 = arith.extf %26 : vector<8x8xbf16> to vector<8x8xf32>
    %28 = arith.truncf %25 : vector<8x8xf32> to vector<8x8xbf16>
    %29 = arith.extf %28 : vector<8x8xbf16> to vector<8x8xf32>
    %30 = arith.subf %16, %27 : vector<8x8xf32>
    %31 = arith.subf %25, %29 : vector<8x8xf32>
    %32 = tpu.concatenate %27, %30, %29, %31 in 1 : vector<8x8xf32>, vector<8x8xf32>, vector<8x8xf32>, vector<8x8xf32> -> vector<8x32xf32>
    %c0_10 = arith.constant 0 : index
    %c0_11 = arith.constant 0 : index
    %33 = vector.load %arg5[%c0_10, %c0_11] : memref<32x768xf32, #tpu.memory_space<vmem>>, vector<32x768xf32>
    %cst_12 = arith.constant dense<0.000000e+00> : vector<8x768xf32>
    %34 = tpu.matmul %32, %33, %cst_12 {dimension_numbers = #tpu.dot_dimension_numbers<[1], [0], [0], [1], [0, 0, 1, 1], [], []>} : vector<8x32xf32>, vector<32x768xf32>, vector<8x768xf32> -> vector<8x768xf32>
    %35 = vector.extract_strided_slice %34 {offsets = [0, 0], sizes = [8, 384], strides = [1, 1]} : vector<8x768xf32> to vector<8x384xf32>
    %36 = vector.extract_strided_slice %34 {offsets = [0, 384], sizes = [8, 384], strides = [1, 1]} : vector<8x768xf32> to vector<8x384xf32>
    %37 = arith.subf %0, %35 : vector<8x384xf32>
    %38 = arith.mulf %37, %36 : vector<8x384xf32>
    %c0_13 = arith.constant 0 : index
    %c0_14 = arith.constant 0 : index
    %39 = vector.load %arg2[%c0_13, %c0_14] : memref<1x384xf32, #tpu.memory_space<vmem>>, vector<1x384xf32>
    %40 = vector.broadcast %39 : vector<1x384xf32> to vector<8x384xf32>
    %41 = arith.mulf %38, %40 : vector<8x384xf32>
    %c0_15 = arith.constant 0 : index
    %c0_16 = arith.constant 0 : index
    %42 = vector.load %arg3[%c0_15, %c0_16] : memref<1x384xf32, #tpu.memory_space<vmem>>, vector<1x384xf32>
    %43 = vector.broadcast %42 : vector<1x384xf32> to vector<8x384xf32>
    %44 = arith.addf %41, %43 : vector<8x384xf32>
    %c0_17 = arith.constant 0 : index
    %c0_18 = arith.constant 0 : index
    %45 = vector.load %arg6[%c0_17, %c0_18] : memref<8x384xf32, #tpu.memory_space<vmem>>, vector<8x384xf32>
    tpu.vector_store %arg6[%c0_17, %c0_18], %44 {strides = array<i32>} : memref<8x384xf32, #tpu.memory_space<vmem>>, vector<8x384xf32>,
    return
  }
  func.func @transform_0(%arg0: i32) -> (i32, i32) {
    %c0_i32 = arith.constant 0 : i32
    %c0_i32_0 = arith.constant 0 : i32
    return %arg0, %c0_i32 : i32, i32
  }
  func.func @transform_1(%arg0: i32) -> (i32, i32) {
    %c0_i32 = arith.constant 0 : i32
    %c0_i32_0 = arith.constant 0 : i32
    %c0_i32_1 = arith.constant 0 : i32
    return %c0_i32, %c0_i32_0 : i32, i32
  }
  func.func @transform_2(%arg0: i32) -> (i32, i32) {
    %c0_i32 = arith.constant 0 : i32
    %c0_i32_0 = arith.constant 0 : i32
    %c0_i32_1 = arith.constant 0 : i32
    return %c0_i32, %c0_i32_0 : i32, i32
  }
  func.func @transform_3(%arg0: i32) -> (i32, i32) {
    %c0_i32 = arith.constant 0 : i32
    %c0_i32_0 = arith.constant 0 : i32
    %c0_i32_1 = arith.constant 0 : i32
    return %c0_i32, %c0_i32_0 : i32, i32
  }
  func.func @transform_4(%arg0: i32) -> (i32, i32) {
    %c0_i32 = arith.constant 0 : i32
    %c0_i32_0 = arith.constant 0 : i32
    %c0_i32_1 = arith.constant 0 : i32
    return %c0_i32, %c0_i32_0 : i32, i32
  }
  func.func @transform_5(%arg0: i32) -> (i32, i32) {
    %c0_i32 = arith.constant 0 : i32
    %c0_i32_0 = arith.constant 0 : i32
    return %arg0, %c0_i32 : i32, i32
  }
}

</mosaic_0001>

<bundles_post_ra>
// kernel: patch_embed.1
= control target key start
LH: loop header
LB: loop body
LE: loop exit
PB: predicated region body
PF: predicated region fallthrough
CT: control target
= control target key end

     0   :  { %s1910_s18 = smov 0   ;;  %s2377_s0 = inlined_call_operand.vmem [shape: f32[25,384], index: 0, kind: input, shape index: {}]   ;;  %s2378_s1 = inlined_call_operand.vmem [shape: f32[1,384], index: 1, kind: input, shape index: {}]   ;;  %s2379_s2 = inlined_call_operand.vmem [shape: f32[1,384], index: 2, kind: input, shape index: {}]   ;;  %s2380_s3 = inlined_call_operand.vmem [shape: f32[384,8], index: 3, kind: input, shape index: {}]   ;;  %s2381_s4 = inlined_call_operand.vmem [shape: f32[32,768], index: 4, kind: input, shape index: {}]   ;;  %s2382_s5 = inlined_call_operand.vmem [shape: f32[25,384], index: 5, kind: output, shape index: {}]  }
   0x1 LB: > { %s1233_s19 = sadd.s32 4294967295, %s1872_s18   ;;  %p1237_p0 = scmp.ge.s32.totalorder %s1872_s18, 1  ;;  %s1872_s18 = sphi %s1910_s18, %s15_s18  }
   0x2   : > { %p187_p1 = scmp.lt.s32.totalorder %s1872_s18, 5 }
   0x4   : > { %p188_p2 = pnand %p1237_p0, %p187_p1 }
   0x5   : > { %v244_v0 = vld [vmem:[%s2380_s3 + $0x80] sm:$0xff] (!%p188_p2)  ;;  %v245_v1 = vld [vmem:[%s2380_s3 + $0x88] sm:$0xff] (!%p188_p2)  ;;  %v1874_v3 = vmov (!%p188_p2), 0.0|0.0   ;;  %p1941_p3 = scmp.lt.s32.totalorder (!%p188_p2), %s1233_s19, 3  ;;  %v246_v10 = vld [vmem:[%s2380_s3 + $0x90] sm:$0xff] (!%p188_p2)  ;;  %vm1875_vm0 = vmmov (!%p188_p2), 0  }
   0x6   : > { %191 = sbr.rel (%p188_p2) target bundleno = 725 (0x2d5), region = 40  ;;  %v260_v2 = vld [vmem:[%s2380_s3 + $0x100] sm:$0xff] (!%p188_p2)  ;;  %1625 = vmatprep.subr.bf16.mxu1 (!%p188_p2), %v1874_v3  ;;  %v1928_v4 = vpack.c.bf16 (!%p188_p2), %v245_v1, %v244_v0  ;;  %v261_v5 = vld [vmem:[%s2380_s3 + $0x108] sm:$0xff] (!%p188_p2)  ;;  %v247_v11 = vld [vmem:[%s2380_s3 + $0x98] sm:$0xff] (!%p188_p2)  ;;  %v1876_v13 = vmov (!%p188_p2), 0.0   ;;  %s1877_s13 = smov (!%p188_p2), 8  }
   0x7   : > { %v228_v6 = vld [vmem:[%s2380_s3] sm:$0xff] (!%p188_p2)  ;;  %v229_v7 = vld [vmem:[%s2380_s3 + $0x8] sm:$0xff] (!%p188_p2)  ;;  %v1945_v8 = vpack.c.bf16 (!%p188_p2), %v261_v5, %v260_v2  ;;  %v262_v12 = vld [vmem:[%s2380_s3 + $0x110] sm:$0xff] (!%p188_p2)  ;;  %1485 = vmatprep.mubr.msk.f32.mxu1 (!%p188_p2), %vm1875_vm0, %v1876_v13  ;;  %v1961_v14 = vpack.c.bf16 (!%p188_p2), %v247_v11, %v246_v10  ;;  %s1878_s24 = smov (!%p188_p2), 16   ;;  %s1879_s25 = smov (!%p188_p2), 24   ;;  %vm882_vm1 = vcmask (!%p188_p2), 64512  }
   0x8   : > { %v1947_v9 = vpack.c.bf16 (!%p188_p2), %v229_v7, %v228_v6  ;;  %1594 = vmatprep.subr.bf16.mxu0 (!%p188_p2), %v1928_v4  ;;  %v263_v15 = vld [vmem:[%s2380_s3 + $0x118] sm:$0xff] (!%p188_p2)  ;;  %v230_v16 = vld [vmem:[%s2380_s3 + $0x10] sm:$0xff] (!%p188_p2)  ;;  %v248_v20 = vld [vmem:[%s2380_s3 + $0xa0] sm:$0xff] (!%p188_p2)  ;;  %vm884_vm2 = vcmask (!%p188_p2), 130048   ;;  %vm886_vm3 = vcmask (!%p188_p2), 195584   ;;  %vm912_vm4 = vcmask (!%p188_p2), 261120  }
   0x9   : > { %v231_v17 = vld [vmem:[%s2380_s3 + $0x18] sm:$0xff] (!%p188_p2)  ;;  %1627 = vmatpush3.bf16.msra.mxu1 (!%p188_p2), %v1945_v8  ;;  %v1974_v18 = vpack.c.bf16 (!%p188_p2), %v263_v15, %v262_v12  ;;  %v249_v21 = vld [vmem:[%s2380_s3 + $0xa8] sm:$0xff] (!%p188_p2)  ;;  %v264_v22 = vld [vmem:[%s2380_s3 + $0x120] sm:$0xff] (!%p188_p2) }
   0xa   : > { %1596 = vmatpush3.bf16.msra.mxu0 (!%p188_p2), %v1947_v9  ;;  %v1976_v19 = vpack.c.bf16 (!%p188_p2), %v231_v17, %v230_v16  ;;  %1628 = vmatprep.subr.bf16.mxu1 (!%p188_p2), %v1874_v3  ;;  %v1989_v23 = vpack.c.bf16 (!%p188_p2), %v249_v21, %v248_v20  ;;  %v265_v24 = vld [vmem:[%s2380_s3 + $0x128] sm:$0xff] (!%p188_p2)  ;;  %v232_v25 = vld [vmem:[%s2380_s3 + $0x20] sm:$0xff] (!%p188_p2)  ;;  %v250_v27 = vld [vmem:[%s2380_s3 + $0xb0] sm:$0xff] (!%p188_p2) }
   0xb   : > { %1598 = vmatprep.subr.bf16.mxu0 (!%p188_p2), %v1961_v14  ;;  %v233_v26 = vld [vmem:[%s2380_s3 + $0x28] sm:$0xff] (!%p188_p2)  ;;  %v251_v28 = vld [vmem:[%s2380_s3 + $0xb8] sm:$0xff] (!%p188_p2)  ;;  %v2014_v29 = vpack.c.bf16 (!%p188_p2), %v265_v24, %v264_v22  ;;  %v266_v31 = vld [vmem:[%s2380_s3 + $0x130] sm:$0xff] (!%p188_p2) }
   0xc   : > { %v2016_v30 = vpack.c.bf16 (!%p188_p2), %v233_v26, %v232_v25  ;;  %v2023_v32 = vpack.c.bf16 (!%p188_p2), %v251_v28, %v250_v27  ;;  %v267_v33 = vld [vmem:[%s2380_s3 + $0x138] sm:$0xff] (!%p188_p2)  ;;  %v234_v34 = vld [vmem:[%s2380_s3 + $0x30] sm:$0xff] (!%p188_p2)  ;;  %v252_v36 = vld [vmem:[%s2380_s3 + $0xc0] sm:$0xff] (!%p188_p2) }
   0xd   : > { %s2385_s19 = smov (!%p1941_p3, %s1233_s19), 3  ;;  %1630 = vmatpush3.bf16.msra.mxu1 %v1974_v18  ;;  %v235_v35 = vld [vmem:[%s2380_s3 + $0x38] sm:$0xff]  ;;  %v253_v37 = vld [vmem:[%s2380_s3 + $0xc8] sm:$0xff]  ;;  %v2043_v38 = vpack.c.bf16 %v267_v33, %v266_v31  ;;  %v268_v40 = vld [vmem:[%s2380_s3 + $0x140] sm:$0xff] }
   0xe   : > { %1600 = vmatpush3.bf16.msra.mxu0 %v1976_v19  ;;  %1631 = vmatprep.subr.bf16.mxu1 %v1874_v3  ;;  %s1849_s23 = smul.u32 24, %s2385_s19  ;;  %v2045_v39 = vpack.c.bf16 %v235_v35, %v234_v34  ;;  %v2052_v41 = vpack.c.bf16 %v253_v37, %v252_v36  ;;  %v269_v42 = vld [vmem:[%s2380_s3 + $0x148] sm:$0xff]  ;;  %v236_v43 = vld [vmem:[%s2380_s3 + $0x40] sm:$0xff]  ;;  %v254_v45 = vld [vmem:[%s2380_s3 + $0xd0] sm:$0xff] }
   0xf   : > { %1602 = vmatprep.subr.bf16.mxu0 %v1989_v23  ;;  %v237_v44 = vld [vmem:[%s2380_s3 + $0x48] sm:$0xff]  ;;  %v255_v46 = vld [vmem:[%s2380_s3 + $0xd8] sm:$0xff]  ;;  %v2076_v47 = vpack.c.bf16 %v269_v42, %v268_v40  ;;  %v270_v49 = vld [vmem:[%s2380_s3 + $0x150] sm:$0xff] }
  0x10   : > { %s219_s7 = scalar_lea.vmem %s2377_s0, %s1849_s23  ;;  %v2078_v48 = vpack.c.bf16 %v237_v44, %v236_v43  ;;  %v2087_v51 = vpack.c.bf16 %v255_v46, %v254_v45  ;;  %v271_v52 = vld [vmem:[%s2380_s3 + $0x158] sm:$0xff]  ;;  %v238_v53 = vld [vmem:[%s2380_s3 + $0x50] sm:$0xff]  ;;  %v256_v56 = vld [vmem:[%s2380_s3 + $0xe0] sm:$0xff]  ;;  %s224_s21 = scalar_lea.vmem %s2382_s5, %s1849_s23 }
  0x11   : > { %1633 = vmatpush3.bf16.msra.mxu1 %v2014_v29  ;;  %v2083_v50 = vld [vmem:[%s219_s7 + $0x8] sm:$0xff]  ;;  %v239_v54 = vld [vmem:[%s2380_s3 + $0x58] sm:$0xff]  ;;  %v2108_v59 = vpack.c.bf16 %v271_v52, %v270_v49  ;;  %v272_v61 = vld [vmem:[%s2380_s3 + $0x160] sm:$0xff] }
  0x12   : > { %1604 = vmatpush3.bf16.msra.mxu0 %v2016_v30  ;;  %1634 = vmatprep.subr.bf16.mxu1 %v1874_v3  ;;  %v277_v55 = vpack.c.bf16 %v2083_v50, %v2083_v50  ;;  %v257_v57 = vld [vmem:[%s2380_s3 + $0xe8] sm:$0xff]  ;;  %v2110_v60 = vpack.c.bf16 %v239_v54, %v238_v53  ;;  %v2115_v62 = vld [vmem:[%s219_s7] sm:$0xff]  ;;  %v2117_v63 = vld [vmem:[%s219_s7 + $0x10] sm:$0xff]  ;;  %v286_v34 = vmul.f32 %v2083_v50, %v2083_v50 }
  0x13   : > { %1606 = vmatprep.subr.bf16.mxu0 %v2023_v32  ;;  %v2121_v0 = vpack.c.bf16 %v257_v57, %v256_v56  ;;  %v273_v1 = vld [vmem:[%s2380_s3 + $0x168] sm:$0xff]  ;;  %v240_v2 = vld [vmem:[%s2380_s3 + $0x60] sm:$0xff]  ;;  %v258_v7 = vld [vmem:[%s2380_s3 + $0xf0] sm:$0xff]  ;;  %v276_v11 = vpack.c.bf16 %v2115_v62, %v2115_v62  ;;  %v278_v12 = vpack.c.bf16 %v2117_v63, %v2117_v63  ;;  %v285_v40 = vmul.f32 %v2115_v62, %v2115_v62 }
  0x14   : > { %v280_v58 = vunpack.c.l.bf16 %v277_v55  ;;  %v241_v5 = vld [vmem:[%s2380_s3 + $0x68] sm:$0xff]  ;;  %v259_v10 = vld [vmem:[%s2380_s3 + $0xf8] sm:$0xff]  ;;  %v2145_v15 = vpack.c.bf16 %v273_v1, %v272_v61  ;;  %v274_v17 = vld [vmem:[%s2380_s3 + $0x170] sm:$0xff]  ;;  %v289_v35 = vpack.c.bf16 %v286_v34, %v286_v34  ;;  %v287_v42 = vmul.f32 %v2117_v63, %v2117_v63 }
  0x15   : > { %1636 = vmatpush3.bf16.msra.mxu1 %v2043_v38  ;;  %v2147_v16 = vpack.c.bf16 %v241_v5, %v240_v2  ;;  %v2154_v20 = vpack.c.bf16 %v259_v10, %v258_v7  ;;  %v275_v21 = vld [vmem:[%s2380_s3 + $0x178] sm:$0xff]  ;;  %v242_v22 = vld [vmem:[%s2380_s3 + $0x70] sm:$0xff]  ;;  %v279_v25 = vunpack.c.l.bf16 %v276_v11  ;;  %v281_v26 = vunpack.c.l.bf16 %v278_v12  ;;  %v896_v55 = vld [vmem:[%s2381_s4 + $0x40] sm:$0xff] }
  0x16   : > { %1608 = vmatpush3.bf16.msra.mxu0 %v2045_v39  ;;  %1637 = vmatprep.subr.bf16.mxu1 %v1874_v3  ;;  %v283_v6 = vsub.f32 %v2083_v50, %v280_v58  ;;  %v243_v24 = vld [vmem:[%s2380_s3 + $0x78] sm:$0xff]  ;;  %v2167_v27 = vpack.c.bf16 %v275_v21, %v274_v17  ;;  %v292_v36 = vunpack.c.l.bf16 %v289_v35  ;;  %v288_v43 = vpack.c.bf16 %v285_v40, %v285_v40  ;;  %v890_v54 = vld [vmem:[%s2381_s4 + $0x10] sm:$0xff]  ;;  %v901_v56 = vld [vmem:[%s2381_s4 + $0x68] sm:$0xff] }
  0x17   : > { %1610 = vmatprep.subr.bf16.mxu0 %v2052_v41  ;;  %v2169_v28 = vpack.c.bf16 %v243_v24, %v242_v22  ;;  %v282_v31 = vsub.f32 %v2115_v62, %v279_v25  ;;  %v284_v33 = vsub.f32 %v2117_v63, %v281_v26  ;;  %v290_v44 = vpack.c.bf16 %v287_v42, %v287_v42  ;;  %v906_v61 = vld [vmem:[%s2381_s4 + $0x90] sm:$0xff]  ;;  %v903_v2 = vld [vmem:[%s2381_s4 + $0x78] sm:$0xff]  ;;  %v909_v5 = vld [vmem:[%s2381_s4 + $0xa8] sm:$0xff] }
  0x18   : > { %361 = vmatprep.mubr.f32.mxu0 %v283_v6  ;;  %v295_v37 = vsub.f32 %v286_v34, %v292_v36  ;;  %v291_v45 = vunpack.c.l.bf16 %v288_v43  ;;  %v1829_v7 = vpack.c.bf16 %v909_v5, %v903_v2  ;;  %v899_v43 = vld [vmem:[%s2381_s4 + $0x58] sm:$0xff] }
  0x19   : > { %1639 = vmatpush3.bf16.msra.mxu1 %v2076_v47  ;;  %v293_v46 = vunpack.c.l.bf16 %v290_v44 }
  0x1a   : > { %1612 = vmatpush3.bf16.msra.mxu0 %v2078_v48  ;;  %1640 = vmatprep.subr.bf16.mxu1 %v1874_v3  ;;  %v294_v49 = vsub.f32 %v285_v40, %v291_v45 }
  0x1b   : > { %1614 = vmatprep.subr.bf16.mxu0 %v2087_v51  ;;  %v296_v52 = vsub.f32 %v287_v42, %v293_v46  ;;  %v893_v42 = vld [vmem:[%s2381_s4 + $0x28] sm:$0xff] }
  0x1c   : > { %v1833_v44 = vpack.c.bf16 %v899_v43, %v893_v42 }
  0x1d   : > { %1642 = vmatpush3.bf16.msra.mxu1 %v2108_v59 }
  0x1e   : > { %1616 = vmatpush3.bf16.msra.mxu0 %v2110_v60  ;;  %1643 = vmatprep.subr.bf16.mxu1 %v1874_v3 }
  0x1f   : > { %1618 = vmatprep.subr.bf16.mxu0 %v2121_v0 }
  0x21   : > { %1645 = vmatpush3.bf16.msra.mxu1 %v2145_v15 }
  0x22   : > { %1620 = vmatpush3.bf16.msra.mxu0 %v2147_v16  ;;  %1646 = vmatprep.subr.bf16.mxu1 %v1874_v3 }
  0x23   : > { %1622 = vmatprep.subr.bf16.mxu0 %v2154_v20 }
  0x25   : > { %1648 = vmatpush3.bf16.msra.mxu1 %v2167_v27 }
  0x26   : > { %1624 = vmatpush3.bf16.msra.mxu0 %v2169_v28  ;;  %1681 = vmatprep.subr.bf16.mxu1 %v1874_v3 }
  0x27   : > { %1650 = vmatprep.subr.bf16.mxu0 %v1928_v4 }
  0x28   : > { %1486 = vmatmul.mubr.f32.vlgmr.msra.gmra.mrb[0].mxu1 %v284_v33 }
  0x29   : > { %362 = vmatmul.mubr.f32.vlgmr.msra.gmra.mrb[0].mxu0 %v282_v31  ;;  %1683 = vmatpush3.bf16.msra.mxu1 %v1945_v8 }
  0x2a   : > { %1652 = vmatpush3.bf16.msra.mxu0 %v1947_v9  ;;  %1684 = vmatprep.subr.bf16.mxu1 %v1874_v3 }
  0x2b   : > { %1654 = vmatprep.subr.bf16.mxu0 %v1961_v14  ;;  %1520 = vmatprep.mubr.msk.f32.mxu1 %vm1875_vm0, %v1876_v13 }
  0x2c   : > { %501 = vmatprep.mubr.f32.mxu0 %v280_v58  ;;  %v1827_v58 = vpack.c.bf16 %v896_v55, %v890_v54  ;;  %v1135_v54 = vld [vmem:[%s2378_s1] sm:$0x7] }
  0x2d   : > { %1686 = vmatpush3.bf16.msra.mxu1 %v1974_v18 }
  0x2e   : > { %1656 = vmatpush3.bf16.msra.mxu0 %v1976_v19  ;;  %1687 = vmatprep.subr.bf16.mxu1 %v1874_v3 }
  0x2f   : > { %1658 = vmatprep.subr.bf16.mxu0 %v1989_v23 }
  0x31   : > { %1689 = vmatpush3.bf16.msra.mxu1 %v2014_v29 }
  0x32   : > { %1660 = vmatpush3.bf16.msra.mxu0 %v2016_v30  ;;  %1690 = vmatprep.subr.bf16.mxu1 %v1874_v3 }
  0x33   : > { %1662 = vmatprep.subr.bf16.mxu0 %v2023_v32 }
  0x35   : > { %1692 = vmatpush3.bf16.msra.mxu1 %v2043_v38 }
  0x36   : > { %1664 = vmatpush3.bf16.msra.mxu0 %v2045_v39  ;;  %1693 = vmatprep.subr.bf16.mxu1 %v1874_v3 }
  0x37   : > { %1666 = vmatprep.subr.bf16.mxu0 %v2052_v41 }
  0x39   : > { %1695 = vmatpush3.bf16.msra.mxu1 %v2076_v47 }
  0x3a   : > { %1668 = vmatpush3.bf16.msra.mxu0 %v2078_v48  ;;  %1696 = vmatprep.subr.bf16.mxu1 %v1874_v3 }
  0x3b   : > { %1670 = vmatprep.subr.bf16.mxu0 %v2087_v51 }
  0x3d   : > { %1698 = vmatpush3.bf16.msra.mxu1 %v2108_v59 }
  0x3e   : > { %1672 = vmatpush3.bf16.msra.mxu0 %v2110_v60  ;;  %1699 = vmatprep.subr.bf16.mxu1 %v1874_v3 }
  0x3f   : > { %1674 = vmatprep.subr.bf16.mxu0 %v2121_v0 }
  0x41   : > { %1701 = vmatpush3.bf16.msra.mxu1 %v2145_v15 }
  0x42   : > { %1676 = vmatpush3.bf16.msra.mxu0 %v2147_v16  ;;  %1702 = vmatprep.subr.bf16.mxu1 %v1874_v3 }
  0x43   : > { %1678 = vmatprep.subr.bf16.mxu0 %v2154_v20 }
  0x45   : > { %1704 = vmatpush3.bf16.msra.mxu1 %v2167_v27 }
  0x46   : > { %1680 = vmatpush3.bf16.msra.mxu0 %v2169_v28  ;;  %1737 = vmatprep.subr.bf16.mxu1 %v1874_v3 }
  0x47   : > { %1706 = vmatprep.subr.bf16.mxu0 %v1928_v4 }
  0x48   : > { %1521 = vmatmul.mubr.f32.vlgmr.msra.gmra.mrb[0].mxu1 %v281_v26 }
  0x49   : > { %502 = vmatmul.mubr.f32.vlgmr.msra.gmra.mrb[2].mxu0 %v279_v25  ;;  %1739 = vmatpush3.bf16.msra.mxu1 %v1945_v8 }
  0x4a   : > { %1708 = vmatpush3.bf16.msra.mxu0 %v1947_v9  ;;  %1740 = vmatprep.subr.bf16.mxu1 %v1874_v3 }
  0x4b   : > { %1710 = vmatprep.subr.bf16.mxu0 %v1961_v14  ;;  %641 = vmatprep.mubr.f32.mxu0 %v295_v37  ;;  %v908_v37 = vld [vmem:[%s2381_s4 + $0xa0] sm:$0xff] }
  0x4c   : > { %1555 = vmatprep.mubr.msk.f32.mxu1 %vm1875_vm0, %v1876_v13 }
  0x4d   : > { %1742 = vmatpush3.bf16.msra.mxu1 %v1974_v18 }
  0x4e   : > { %1712 = vmatpush3.bf16.msra.mxu0 %v1976_v19  ;;  %1743 = vmatprep.subr.bf16.mxu1 %v1874_v3 }
  0x4f   : > { %1714 = vmatprep.subr.bf16.mxu0 %v1989_v23 }
  0x51   : > { %1745 = vmatpush3.bf16.msra.mxu1 %v2014_v29 }
  0x52   : > { %1716 = vmatpush3.bf16.msra.mxu0 %v2016_v30  ;;  %1746 = vmatprep.subr.bf16.mxu1 %v1874_v3 }
  0x53   : > { %1718 = vmatprep.subr.bf16.mxu0 %v2023_v32 }
  0x55   : > { %1748 = vmatpush3.bf16.msra.mxu1 %v2043_v38 }
  0x56   : > { %1720 = vmatpush3.bf16.msra.mxu0 %v2045_v39  ;;  %1749 = vmatprep.subr.bf16.mxu1 %v1874_v3 }
  0x57   : > { %1722 = vmatprep.subr.bf16.mxu0 %v2052_v41 }
  0x59   : > { %1751 = vmatpush3.bf16.msra.mxu1 %v2076_v47 }
  0x5a   : > { %1724 = vmatpush3.bf16.msra.mxu0 %v2078_v48  ;;  %1752 = vmatprep.subr.bf16.mxu1 %v1874_v3 }
  0x5b   : > { %1726 = vmatprep.subr.bf16.mxu0 %v2087_v51 }
  0x5d   : > { %1754 = vmatpush3.bf16.msra.mxu1 %v2108_v59 }
  0x5e   : > { %1728 = vmatpush3.bf16.msra.mxu0 %v2110_v60  ;;  %1755 = vmatprep.subr.bf16.mxu1 %v1874_v3 }
  0x5f   : > { %1730 = vmatprep.subr.bf16.mxu0 %v2121_v0 }
  0x61   : > { %1757 = vmatpush3.bf16.msra.mxu1 %v2145_v15 }
  0x62   : > { %1732 = vmatpush3.bf16.msra.mxu0 %v2147_v16  ;;  %1758 = vmatprep.subr.bf16.mxu1 %v1874_v3 }
  0x63   : > { %1734 = vmatprep.subr.bf16.mxu0 %v2154_v20 }
  0x65   : > { %1760 = vmatpush3.bf16.msra.mxu1 %v2167_v27 }
  0x66   : > { %1736 = vmatpush3.bf16.msra.mxu0 %v2169_v28  ;;  %1793 = vmatprep.subr.bf16.mxu1 %v1874_v3 }
  0x67   : > { %1762 = vmatprep.subr.bf16.mxu0 %v1928_v4 }
  0x68   : > { %1556 = vmatmul.mubr.f32.vlgmr.msra.gmra.mrb[2].mxu1 %v296_v52 }
  0x69   : > { %642 = vmatmul.mubr.f32.vlgmr.msra.gmra.mrb[4].mxu0 %v294_v49  ;;  %1795 = vmatpush3.bf16.msra.mxu1 %v1945_v8 }
  0x6a   : > { %1764 = vmatpush3.bf16.msra.mxu0 %v1947_v9  ;;  %1796 = vmatprep.subr.bf16.mxu1 %v1874_v3 }
  0x6b   : > { %1766 = vmatprep.subr.bf16.mxu0 %v1961_v14  ;;  %1590 = vmatprep.mubr.msk.f32.mxu1 %vm1875_vm0, %v1876_v13 }
  0x6c   : > { %781 = vmatprep.mubr.f32.mxu0 %v292_v36  ;;  %v902_v36 = vld [vmem:[%s2381_s4 + $0x70] sm:$0xff] }
  0x6d   : > { %1798 = vmatpush3.bf16.msra.mxu1 %v1974_v18  ;;  %v1831_v40 = vpack.c.bf16 %v908_v37, %v902_v36 }
  0x6e   : > { %1768 = vmatpush3.bf16.msra.mxu0 %v1976_v19  ;;  %1799 = vmatprep.subr.bf16.mxu1 %v1874_v3 }
  0x6f   : > { %1770 = vmatprep.subr.bf16.mxu0 %v1989_v23 }
  0x71   : > { %1801 = vmatpush3.bf16.msra.mxu1 %v2014_v29  ;;  %v889_v29 = vld [vmem:[%s2381_s4 + $0x8] sm:$0xff] }
  0x72   : > { %1772 = vmatpush3.bf16.msra.mxu0 %v2016_v30  ;;  %1802 = vmatprep.subr.bf16.mxu1 %v1874_v3  ;;  %v895_v30 = vld [vmem:[%s2381_s4 + $0x38] sm:$0xff] }
  0x73   : > { %1774 = vmatprep.subr.bf16.mxu0 %v2023_v32  ;;  %v888_v32 = vld [vmem:[%s2381_s4] sm:$0xff] }
  0x75   : > { %1804 = vmatpush3.bf16.msra.mxu1 %v2043_v38 }
  0x76   : > { %1776 = vmatpush3.bf16.msra.mxu0 %v2045_v39  ;;  %1805 = vmatprep.subr.bf16.mxu1 %v1874_v3  ;;  %v1817_v39 = vpack.c.bf16 %v895_v30, %v889_v29 }
  0x77   : > { %1778 = vmatprep.subr.bf16.mxu0 %v2052_v41  ;;  %v894_v41 = vld [vmem:[%s2381_s4 + $0x30] sm:$0xff] }
  0x79   : > { %1807 = vmatpush3.bf16.msra.mxu1 %v2076_v47  ;;  %v891_v47 = vld [vmem:[%s2381_s4 + $0x18] sm:$0xff] }
  0x7a   : > { %1780 = vmatpush3.bf16.msra.mxu0 %v2078_v48  ;;  %1808 = vmatprep.subr.bf16.mxu1 %v1874_v3  ;;  %v897_v48 = vld [vmem:[%s2381_s4 + $0x48] sm:$0xff] }
  0x7b   : > { %1782 = vmatprep.subr.bf16.mxu0 %v2087_v51  ;;  %v1819_v51 = vpack.c.bf16 %v894_v41, %v888_v32  ;;  %v1825_v53 = vpack.c.bf16 %v897_v48, %v891_v47  ;;  %v1137_v48 = vlaneseq }
  0x7d   : > { %1810 = vmatpush3.bf16.msra.mxu1 %v2108_v59  ;;  %v907_v59 = vld [vmem:[%s2381_s4 + $0x98] sm:$0xff] }
  0x7e   : > { %1784 = vmatpush3.bf16.msra.mxu0 %v2110_v60  ;;  %1811 = vmatprep.subr.bf16.mxu1 %v1874_v3  ;;  %v900_v60 = vld [vmem:[%s2381_s4 + $0x60] sm:$0xff] }
  0x7f   : > { %1786 = vmatprep.subr.bf16.mxu0 %v2121_v0  ;;  %v1821_v0 = vpack.c.bf16 %v907_v59, %v901_v56  ;;  %v1823_v1 = vpack.c.bf16 %v906_v61, %v900_v60 }
  0x81   : > { %1813 = vmatpush3.bf16.msra.mxu1 %v2145_v15 }
  0x82   : > { %1788 = vmatpush3.bf16.msra.mxu0 %v2147_v16  ;;  %1814 = vmatprep.subr.bf16.mxu1 %v1874_v3 }
  0x83   : > { %1790 = vmatprep.subr.bf16.mxu0 %v2154_v20 }
  0x85   : > { %1816 = vmatpush3.bf16.msra.mxu1 %v2167_v27 }
  0x86   : > { %1792 = vmatpush3.bf16.msra.mxu0 %v2169_v28  ;;  %1826 = vmatprep.subr.bf16.mxu1 %v1825_v53 }
  0x87   : > { %1818 = vmatprep.subr.bf16.mxu0 %v1817_v39  ;;  %v910_v39 = vld [vmem:[%s2381_s4 + $0xb0] sm:$0xff] }
  0x88   : > { %1591 = vmatmul.mubr.f32.vlgmr.msra.gmra.mrb[2].mxu1 %v293_v46 }
  0x89   : > { %782 = vmatmul.mubr.f32.vlgmr.msra.gmra.mrb[6].mxu0 %v291_v45  ;;  %1051 = vmatprep.mubr.f32.mxu1 %v1876_v13 }
  0x8a   : > { %980 = vmatprep.mubr.f32.mxu0 %v1876_v13  ;;  %1820 = vmatpush1.bf16.msra.mxu0 %v1819_v51  ;;  %v1138_v51 = vshrl.u32 %v1137_v48, 7 }
  0x8b   : > { %1828 = vmatpush1.bf16.msra.mxu1 %v1827_v58  ;;  %1822 = vmatprep.subr.bf16.mxu0 %v1821_v0 }
  0x8c   : > { %1830 = vmatprep.subr.bf16.mxu1 %v1829_v7  ;;  %v1139_v53 = vsub.s32 0, %v1138_v51  ;;  %v1147_v2 = vsub.s32 2, %v1138_v51 }
  0x8e   : > { %1824 = vmatpush1.bf16.msra.mxu0 %v1823_v1  ;;  %v1140_v60 = vrot.slane %v1135_v54, %v1139_v53  ;;  %v1143_v1 = vsub.s32 1, %v1138_v51 }
  0x8f   : > { %1832 = vmatpush1.bf16.msra.mxu1 %v1831_v40  ;;  %1834 = vmatprep.subr.bf16.mxu0 %v1833_v44 }
  0xfc   : > { %v1277_v4 = vpop.f32.mrb[0].mxu0 }
  0xfd   : > { %v1278_v8 = vpop.f32.mrb[1].mxu0 }
  0xfe   : > { %v1279_v9 = vadd.f32 %v1278_v8, %v1277_v4  ;;  %v892_v8 = vld [vmem:[%s2381_s4 + $0x20] sm:$0xff] }
 0x11b   : > { %v573_v14 = vpop.f32.mrb[0].mxu1 }
 0x11c   : > { %v1329_v18 = vpop.f32.mrb[2].mxu0  ;;  %v1522_v19 = vpop.f32.mrb[1].mxu1 }
 0x11d   : > { %v1330_v23 = vpop.f32.mrb[3].mxu0 }
 0x11e   : > { %v1331_v3 = vadd.f32 %v1330_v23, %v1329_v18  ;;  %v911_v18 = vld [vmem:[%s2381_s4 + $0xb8] sm:$0xff] }
 0x120   : > { %v1841_v38 = vadd.f32 %v1331_v3, %v1279_v9  ;;  %v898_v9 = vld [vmem:[%s2381_s4 + $0x50] sm:$0xff] }
 0x121   : > { %v1835_v29 = vpack.c.bf16 %v898_v9, %v892_v8 }
 0x122   : > { %v1842_v57 = vadd.f32 %v1841_v38, %v573_v14  ;;  %v905_v14 = vld [vmem:[%s2381_s4 + $0x88] sm:$0xff]  ;;  %v904_v38 = vld [vmem:[%s2381_s4 + $0x80] sm:$0xff] }
 0x123   : > { %v1837_v32 = vpack.c.bf16 %v911_v18, %v905_v14  ;;  %v1839_v47 = vpack.c.bf16 %v910_v39, %v904_v38 }
 0x124   : > { %v857_v6 = vmul.f32 0.020833334, %v1842_v57  ;;  %v1155_v57 = vld [vmem:[%s2379_s2] sm:$0x7] }
 0x125   : > { %v1160_v0 = vrot.slane %v1155_v57, %v1139_v53 }
 0x126   : > { %v864_v10 = vpack.c.bf16 %v857_v6, %v857_v6  ;;  %v859_v31 = vmul.f32 %v857_v6, %v857_v6 }
 0x128   : > { %v865_v11 = vunpack.c.l.bf16 %v864_v10  ;;  %v1144_v10 = vrot.slane %v1135_v54, %v1143_v1 }
 0x12a   : > { %v868_v12 = vsub.f32 %v857_v6, %v865_v11 }
 0x12c   : > { %871 = vrot.lane.b32.xlu0 %v868_v12, %s1877_s13  ;;  %v1148_v12 = vrot.slane %v1135_v54, %v1147_v2 }
 0x13c   : > { %v1381_v15 = vpop.f32.mrb[4].mxu0 }
 0x13d   : > { %v1382_v16 = vpop.f32.mrb[5].mxu0 }
 0x13e   : > { %v1383_v17 = vadd.f32 %v1382_v16, %v1381_v15  ;;  %v1164_v16 = vrot.slane %v1155_v57, %v1143_v1 }
 0x15b   : > { %v853_v20 = vpop.f32.mrb[2].mxu1 }
 0x15c   : > { %v1433_v21 = vpop.f32.mrb[6].mxu0  ;;  %v1592_v22 = vpop.f32.mrb[3].mxu1 }
 0x15d   : > { %v1434_v24 = vpop.f32.mrb[7].mxu0 }
 0x15e   : > { %v1435_v25 = vadd.f32 %v1434_v24, %v1433_v21  ;;  %v1168_v21 = vrot.slane %v1155_v57, %v1147_v2 }
 0x160   : > { %v1843_v26 = vadd.f32 %v1435_v25, %v1383_v17 }
 0x162   : > { %v1844_v27 = vadd.f32 %v1843_v26, %v853_v20 }
 0x164   : > { %v858_v28 = vmul.f32 0.020833334, %v1844_v27 }
 0x166   : > { %v860_v33 = vsub.f32 %v858_v28, %v859_v31 }
 0x168   : > { %v861_v34 = vmax.f32 %v860_v33, 0.0 }
 0x16a   : > { %v862_v35 = vadd.f32 1e-06, %v861_v34 }
 0x16c   : > { %1864 = vrsqrt.f32 %v862_v35 }
 0x176   : > { %v1865_v45 = vpop.eup %1864 }
 0x177   : > { %v866_v46 = vpack.c.bf16 %v1865_v45, %v1865_v45 }
 0x179   : > { %v867_v49 = vunpack.c.l.bf16 %v866_v46 }
 0x17b   : > { %875 = vrot.lane.b32.xlu0 %v867_v49, %s1878_s24  ;;  %v869_v52 = vsub.f32 %v1865_v45, %v867_v49 }
 0x17d   : > { %879 = vrot.lane.b32.xlu1 %v869_v52, %s1879_s25 }
 0x19e   : > { %v872_v4 = vpop.permute.xlu0 %871 }
 0x19f   : > { %v883_v19 = vsel %vm882_vm1, %v865_v11, %v872_v4 }
 0x1ed   : > { %v876_v23 = vpop.permute.xlu0 %875 }
 0x1ee   : > { %v885_v3 = vsel %vm884_vm2, %v883_v19, %v876_v23 }
 0x1ef   : > { %v880_v30 = vpop.permute.xlu1 %879 }
 0x1f0   : > { %v887_v41 = vsel %vm886_vm3, %v885_v3, %v880_v30 }
 0x1f1   : > { %1240 = vmatmul.mubr.msk.f32.vlgmr.msra.gmra.mrb[8].mxu0 %vm912_vm4, %v887_v41  ;;  %1241 = vmatmul.mubr.msk.f32.vlgmr.msra.gmra.mrb[4].mxu1 %vm912_vm4, %v887_v41 }
 0x1f2   : > { %1836 = vmatpush1.bf16.msra.mxu0 %v1835_v29  ;;  %1122 = vmatprep.mubr.f32.mxu0 %v1876_v13 }
 0x1f3   : > { %1838 = vmatprep.subr.bf16.mxu0 %v1837_v32 }
 0x1f6   : > { %1840 = vmatpush1.bf16.msra.mxu0 %v1839_v47 }
 0x1f9   : > { %1242 = vmatmul.mubr.msk.f32.vlgmr.msra.gmra.mrb[10].mxu0 %vm912_vm4, %v887_v41 }
 0x2c4   : > { %v982_v55 = vpop.f32.mrb[8].mxu0  ;;  %v1053_v56 = vpop.f32.mrb[4].mxu1 }
 0x2c5   : > { %v1129_v58 = vsub.f32 %v2115_v62, %v982_v55  ;;  %v984_v13 = vpop.f32.mrb[9].mxu0  ;;  %v1055_v59 = vpop.f32.mrb[5].mxu1  ;;  %v1131_v11 = vsub.f32 %v2117_v63, %v1053_v56 }
 0x2c6   : > { %v1130_v6 = vsub.f32 %v2083_v50, %v984_v13 }
 0x2c7   : > { %v1132_v61 = vmul.f32 %v1129_v58, %v1055_v59 }
 0x2c9   : > { %v1152_v5 = vmul.f32 %v1140_v60, %v1132_v61 }
 0x2cb   : > { %v1172_v7 = vadd.f32 %v1160_v0, %v1152_v5 }
 0x2cc   : > { %v1124_v62 = vpop.f32.mrb[10].mxu0 }
 0x2cd   : > { %1175 = vst [vmem:[%s224_s21] sm:$0xff] %v1172_v7  ;;  %v1133_v15 = vmul.f32 %v1130_v6, %v1124_v62  ;;  %v1126_v17 = vpop.f32.mrb[11].mxu0 }
 0x2ce   : > { %v1134_v20 = vmul.f32 %v1131_v11, %v1126_v17 }
 0x2cf   : > { %v1153_v22 = vmul.f32 %v1144_v10, %v1133_v15 }
 0x2d0   : > { %v1154_v24 = vmul.f32 %v1148_v12, %v1134_v20 }
 0x2d1   : > { %v1173_v25 = vadd.f32 %v1164_v16, %v1153_v22 }
 0x2d2   : > { %v1174_v26 = vadd.f32 %v1168_v21, %v1154_v24 }
 0x2d3   : > { %1176 = vst [vmem:[%s224_s21 + $0x8] sm:$0xff] %v1173_v25 }
 0x2d4   : > { %1177 = vst [vmem:[%s224_s21 + $0x10] sm:$0xff] %v1174_v26 }
 0x2d5 PF: > { %s15_s18 = sadd.s32 1, %s1872_s18  }
 0x2d6   : > { %p12_p4 = scmp.ge.s32.totalorder %s15_s18, 6  }
 0x2d8   :  { %14 = sbr.rel (!%p12_p4) target bundleno = 1 (0x1), region = 70 }

</bundles_post_ra>
